<compile_context>
chip_gen: v5e
topology: v5e:2x2
jax: 0.10.0
libtpu: 0.0.40
codegen_flags: <defaults>
</compile_context>

<pallas_src>
import math

import jax
import jax.numpy as jnp
from jax import lax
from jax.experimental import pallas as pl
from jax.experimental.pallas import tpu as pltpu

_EPS = 1e-12  # matches torch.nn.functional.normalize default eps


# ----------------------------------------------------------------------------
# Fused CODA-Prompt kernel
# ----------------------------------------------------------------------------
def _coda_fused_kernel(x_ref, wnum_ref, wden_ref, p_ref, out_ref):
    """One grid step handles one batch tile.

    x_ref    : [bt, D]     query tile
    wnum_ref : [P, D]      A_eff * normalize(K)   (precomputed per layer)
    wden_ref : [P, D]      A_eff * A_eff          (ones when attention disabled)
    p_ref    : [P, L*E]    flattened prompt table
    out_ref  : [bt, L*E]   P_ (lane-dense)
    """
    x = x_ref[...].astype(jnp.float32)
    wnum = wnum_ref[...].astype(jnp.float32)
    wden = wden_ref[...].astype(jnp.float32)

    # Contract feature dim of both operands directly (no k.T materialization).
    dn = (((1,), (1,)), ((), ()))
    num = lax.dot_general(x, wnum, dn, preferred_element_type=jnp.float32)          # [bt, P]
    den_sq = lax.dot_general(x * x, wden, dn, preferred_element_type=jnp.float32)   # [bt, P]

    # num / max(sqrt(den_sq), eps) == num * rsqrt(max(den_sq, eps^2))  (EUP rsqrt)
    aq_k = num * lax.rsqrt(jnp.maximum(den_sq, _EPS * _EPS))                         # [bt, P]

    out_ref[...] = jnp.dot(
        aq_k, p_ref[...].astype(jnp.float32), preferred_element_type=jnp.float32
    ).astype(out_ref.dtype)                                                          # [bt, L*E]


def _pick_batch_tile(B):
    """Largest tile from a lane/sublane-friendly ladder that divides B; else whole B."""
    for t in (1024, 512, 256, 128, 64, 32, 16, 8):
        if B > t and B % t == 0:
            return t
    return B


def coda_prompt_weighting(x, w_num, w_den, p_flat):
    """x: [B, D], w_num/w_den: [P, D], p_flat: [P, L*E]  ->  P_ flat [B, L*E] (f32)."""
    B, D = x.shape
    P, LE = p_flat.shape
    bt = _pick_batch_tile(B)
    nb = B // bt
    return pl.pallas_call(
        _coda_fused_kernel,
        out_shape=jax.ShapeDtypeStruct((B, LE), jnp.float32),
        grid=(nb,),
        in_specs=[
            pl.BlockSpec((bt, D), lambda i: (i, 0)),   # query tile marches over batch
            pl.BlockSpec((P, D), lambda i: (0, 0)),    # weights stay resident
            pl.BlockSpec((P, D), lambda i: (0, 0)),
            pl.BlockSpec((P, LE), lambda i: (0, 0)),
        ],
        out_specs=pl.BlockSpec((bt, LE), lambda i: (i, 0)),
        compiler_params=pltpu.CompilerParams(
            dimension_semantics=("parallel",),          # shard batch tiles across TCs (v7x)
            vmem_limit_bytes=32 * 1024 * 1024,          # lift v5e's 16 MiB scoped default
        ),
    )(x, w_num, w_den, p_flat)


# ----------------------------------------------------------------------------
# Plain-JAX glue (init + train-only loss)
# ----------------------------------------------------------------------------
def ortho_penalty(t):
    n = t.shape[0]
    g = jnp.matmul(t, t.T) - jnp.eye(n, dtype=t.dtype)
    return jnp.mean(g * g) * 1e-6


def _uniform_init(key, shape, dtype=jnp.float32):
    # nn.init.uniform_ default: U[0, 1)
    return jax.random.uniform(key, shape, dtype=dtype)


def _orthogonal_init(key, shape, dtype=jnp.float32):
    # nn.init.orthogonal_ flattens trailing dims.
    rows = shape[0]
    cols = int(math.prod(shape[1:]))
    mat = jax.nn.initializers.orthogonal()(key, (rows, cols), dtype)
    return mat.reshape(shape)


# ----------------------------------------------------------------------------
# CodaPrompt module (JAX/Pallas)
# ----------------------------------------------------------------------------
class CodaPromptPallas:
    def __init__(self, emb_d, n_tasks, prompt_param, key_dim=768, seed=0):
        self.task_id = 0
        self.emb_d = emb_d
        self.key_d = key_dim
        self.n_tasks = n_tasks
        self._init_smart(emb_d, prompt_param)
        self.counter = 0
        self.next_task_locs = None
        self.task_count_f = 0

        key = jax.random.PRNGKey(seed)
        self.params = {}
        for e in self.e_layers:
            key, kp, kk, ka = jax.random.split(key, 4)
            if self.ortho_mu == -1:
                p = _uniform_init(kp, (self.e_pool_size, self.e_p_length, emb_d))
                k = _uniform_init(kk, (self.e_pool_size, self.key_d))
                a = _uniform_init(ka, (self.e_pool_size, self.key_d))
            else:
                p_init = _uniform_init if self.ortho_mu == 4 else _orthogonal_init
                a_init = _uniform_init if self.ortho_mu == 5 else _orthogonal_init
                k_init = _uniform_init if self.ortho_mu == 6 else _orthogonal_init
                p = p_init(kp, (self.e_pool_size, self.e_p_length, emb_d))
                a = a_init(ka, (self.e_pool_size, self.key_d))
                k = k_init(kk, (self.e_pool_size, self.key_d))
            self.params[f"e_p_{e}"] = p
            self.params[f"e_k_{e}"] = k
            self.params[f"e_a_{e}"] = a

        # Key-side precompute cached per layer (does not depend on the query).
        self._derived = {e: self._derive(e) for e in self.e_layers}

    def _init_smart(self, emb_d, prompt_param):
        self.e_pool_size = int(prompt_param[0])
        self.e_p_length = int(prompt_param[1])
        e_layer_map = {
            0: [0, 1, 2, 3, 4], 1: [0], 2: [1], 3: [2], 4: [3], 5: [4],
            6: [0, 1], 7: [1, 2], 8: [2, 3], 9: [3, 4],
            10: [0, 1, 2], 11: [1, 2, 3], 12: [2, 3, 4],
        }
        self.e_layers = e_layer_map.get(int(prompt_param[2]), None)
        if self.e_layers is None:
            print("error")
        self.ortho_mu = int(prompt_param[3])
        self.attention = True
        self.attention_softmax = True
        self.expand_and_freeze = True
        if prompt_param[4] > 0:
            if prompt_param[4] == 1:
                self.attention = False
                self.attention_softmax = False
            elif prompt_param[4] == 2:
                self.attention_softmax = False
            elif prompt_param[4] == 3:
                self.expand_and_freeze = False
                self.attention_softmax = False

    def _derive(self, e):
        """Precompute W_num = A_eff*normalize(K), W_den = A_eff^2, flattened prompts."""
        K = self.params[f"e_k_{e}"].astype(jnp.float32)
        A = self.params[f"e_a_{e}"].astype(jnp.float32)
        p = self.params[f"e_p_{e}"].astype(jnp.float32)
        n_K = K * lax.rsqrt(jnp.maximum(jnp.sum(K * K, axis=1, keepdims=True), _EPS * _EPS))
        if self.attention:
            A_eff = jax.nn.softmax(A, axis=1) if self.attention_softmax else A
            w_num = A_eff * n_K
            w_den = A_eff * A_eff
        else:
            # no-attention path: aq_k = normalize(x) @ n_K.T  ==  (x @ n_K.T) * rsqrt(x.x)
            w_num = n_K
            w_den = jnp.ones_like(n_K)
        p_flat = p.reshape(self.e_pool_size, self.e_p_length * self.emb_d)
        return {"w_num": w_num, "w_den": w_den, "p_flat": p_flat}

    def process_frequency(self, next_task_locs=None):
        self.task_count_f += 1

    def next_task_locs_f(self, next_task_locs=None):
        if next_task_locs:
            self.next_task_locs = next_task_locs

    def forward(self, x_querry, l, x_block, train=False, task_id=None):
        e_valid = l in self.e_layers
        loss = 0
        P_ = None
        p_return = None

        if e_valid:
            B, C = x_querry.shape
            pt = int(self.e_pool_size / self.n_tasks)
            s = int(self.task_id * pt)
            f = int((self.task_id + 1) * pt)

            d = self._derived[l]
            w_num, w_den, p_flat = d["w_num"], d["w_den"], d["p_flat"]
            if self.expand_and_freeze:
                # Forward values of the reference's train slice
                # cat(K[:s].detach(), K[s:f]) equal K[:f]; eval uses K[:f] as well.
                # TODO(synk): detach()-based gradient freezing is a backward-pass concern
                # and is not modeled in this forward-only port.
                w_num, w_den, p_flat = w_num[:f], w_den[:f], p_flat[:f]

            # --- fused Pallas kernel: attention weighting + prompt composition ---
            P_flat = coda_prompt_weighting(
                x_querry.astype(jnp.float32), w_num, w_den, p_flat)
            P_ = P_flat.reshape(B, self.e_p_length, self.emb_d)

            i = self.e_p_length // 2
            Ek = P_[:, :i, :]
            Ev = P_[:, i:, :]

            if train and self.ortho_mu > 0:
                K = self.params[f"e_k_{l}"]
                A = self.params[f"e_a_{l}"]
                p = self.params[f"e_p_{l}"]
                if self.expand_and_freeze:
                    K, A, p = K[:f], A[:f], p[:f]
                p2 = p.reshape(p.shape[0], -1)
                if self.ortho_mu == 1:
                    loss = ortho_penalty(K)
                elif self.ortho_mu == 2:
                    loss = ortho_penalty(A)
                elif self.ortho_mu == 3:
                    loss = ortho_penalty(p2)
                elif self.ortho_mu == 4:
                    loss = ortho_penalty(K) + ortho_penalty(A)
                elif self.ortho_mu == 5:
                    loss = ortho_penalty(K) + ortho_penalty(p2)
                elif self.ortho_mu == 6:
                    loss = ortho_penalty(A) + ortho_penalty(p2)
                elif self.ortho_mu == 7:
                    loss = ortho_penalty(K) + ortho_penalty(A) + ortho_penalty(p2)

            p_return = [Ek, Ev]

        if train:
            return p_return, loss, x_block, P_
        else:
            return p_return, 0, x_block


# ----------------------------------------------------------------------------
# Pure-JAX reference of the forward math (for a correctness check in the demo)
# ----------------------------------------------------------------------------
def _ref_coda_weighting(x, K, A, p, attention, attention_softmax):
    eps = _EPS
    n_K = K / jnp.maximum(jnp.linalg.norm(K, axis=1, keepdims=True), eps)
    if attention:
        A_eff = jax.nn.softmax(A, axis=1) if attention_softmax else A
        a_q = jnp.einsum("bd,kd->bkd", x, A_eff)
        q = a_q / jnp.maximum(jnp.linalg.norm(a_q, axis=2, keepdims=True), eps)
        aq_k = jnp.einsum("bkd,kd->bk", q, n_K)
    else:
        qn = x / jnp.maximum(jnp.linalg.norm(x, axis=1, keepdims=True), eps)
        aq_k = jnp.einsum("bd,kd->bk", qn, n_K)
    return jnp.einsum("bk,kld->bld", aq_k, p)


# ----------------------------------------------------------------------------
# Demo
# ----------------------------------------------------------------------------
if __name__ == "__main__":
    emb_d = 32
    key_dim = 32
    n_tasks = 4
    B = 2
    # prompt_param = [e_pool_size, e_p_length, e_layer_code, ortho_mu, attention_code]
    prompt_param = [8, 8, 12, -1, 0]   # e_layers = [2, 3, 4], uniform init, attention+softmax

    model = CodaPromptPallas(emb_d, n_tasks, prompt_param, key_dim=key_dim, seed=0)

    k_all = jax.random.PRNGKey(0)
    kq, kb = jax.random.split(k_all)
    x_querry = jax.random.normal(kq, (B, key_dim), dtype=jnp.float32)
    x_block = jax.random.normal(kb, (B, 8, emb_d), dtype=jnp.float32)

    # e-layer, eval
    (Ek, Ev), loss_e, xb = model.forward(x_querry, l=2, x_block=x_block, train=False)
    assert Ek.shape == (B, prompt_param[1] // 2, emb_d)
    assert Ev.shape == (B, prompt_param[1] // 2, emb_d)

    # e-layer, train (returns P_ as well)
    (Tk, Tv), tloss, _, P_train = model.forward(
        x_querry, l=3, x_block=x_block, train=True, task_id=0)
    assert P_train.shape == (B, prompt_param[1], emb_d)

    # non-e layer: pass-through
    p_none, loss0, xb0 = model.forward(x_querry, l=0, x_block=x_block, train=False)
    assert p_none is None and loss0 == 0

    # numerical check vs. the literal reference math (sliced to the current task pool)
    pt = prompt_param[0] // n_tasks
    f = (model.task_id + 1) * pt
    K = model.params["e_k_2"][:f]
    A = model.params["e_a_2"][:f]
    p = model.params["e_p_2"][:f]
    P_ref = _ref_coda_weighting(x_querry, K, A, p,
                                model.attention, model.attention_softmax)
    P_ker = jnp.concatenate([Ek, Ev], axis=1)
    assert jnp.allclose(P_ker, P_ref, rtol=1e-4, atol=1e-4), "mismatch vs reference"

    jax.block_until_ready((Ek, Ev, Tk, Tv, P_train, xb))
    print("KERNEL_OK")
</pallas_src>

<mosaic_0001>
module attributes {stable_mosaic.version = 11 : i64} {
  func.func @_coda_fused_kernel(%arg0: i32, %arg1: memref<2x32xf32, #tpu.memory_space<vmem>>, %arg2: memref<2x32xf32, #tpu.memory_space<vmem>>, %arg3: memref<2x32xf32, #tpu.memory_space<vmem>>, %arg4: memref<2x256xf32, #tpu.memory_space<vmem>>, %arg5: memref<2x256xf32, #tpu.memory_space<vmem>>) attributes {dimension_semantics = [#tpu.dimension_semantics<parallel>], iteration_bounds = array<i64: 1>, scalar_prefetch = 0 : i64, scratch_operands = 0 : i64, tpu.core_type = #tpu.core_type<tc>, window_params = [{transform_indices = @transform_0, window_bounds = array<i64: 2, 32>}, {pipeline_mode = #tpu.pipeline_mode<synchronous>, transform_indices = @transform_1, window_bounds = array<i64: 2, 32>}, {pipeline_mode = #tpu.pipeline_mode<synchronous>, transform_indices = @transform_2, window_bounds = array<i64: 2, 32>}, {pipeline_mode = #tpu.pipeline_mode<synchronous>, transform_indices = @transform_3, window_bounds = array<i64: 2, 256>}, {transform_indices = @transform_4, window_bounds = array<i64: 2, 256>}]} {
    %c0 = arith.constant 0 : index
    %c0_0 = arith.constant 0 : index
    %0 = vector.load %arg1[%c0, %c0_0] : memref<2x32xf32, #tpu.memory_space<vmem>>, vector<2x32xf32>
    %c0_1 = arith.constant 0 : index
    %c0_2 = arith.constant 0 : index
    %1 = vector.load %arg2[%c0_1, %c0_2] : memref<2x32xf32, #tpu.memory_space<vmem>>, vector<2x32xf32>
    %c0_3 = arith.constant 0 : index
    %c0_4 = arith.constant 0 : index
    %2 = vector.load %arg3[%c0_3, %c0_4] : memref<2x32xf32, #tpu.memory_space<vmem>>, vector<2x32xf32>
    %cst = arith.constant dense<0.000000e+00> : vector<2x2xf32>
    %3 = tpu.matmul %0, %1, %cst {dimension_numbers = #tpu.dot_dimension_numbers<[1], [1], [0], [0], [0, 0, 1, 0], [], []>} : vector<2x32xf32>, vector<2x32xf32>, vector<2x2xf32> -> vector<2x2xf32>
    %4 = arith.mulf %0, %0 : vector<2x32xf32>
    %cst_5 = arith.constant dense<0.000000e+00> : vector<2x2xf32>
    %5 = tpu.matmul %4, %2, %cst_5 {dimension_numbers = #tpu.dot_dimension_numbers<[1], [1], [0], [0], [0, 0, 1, 0], [], []>} : vector<2x32xf32>, vector<2x32xf32>, vector<2x2xf32> -> vector<2x2xf32>
    %cst_6 = arith.constant 1.000000e-24 : f32
    %6 = vector.broadcast %cst_6 : f32 to vector<2x2xf32>
    %7 = arith.maximumf %5, %6 : vector<2x2xf32>
    %8 = math.rsqrt %7 : vector<2x2xf32>
    %9 = arith.mulf %3, %8 : vector<2x2xf32>
    %c0_7 = arith.constant 0 : index
    %c0_8 = arith.constant 0 : index
    %10 = vector.load %arg4[%c0_7, %c0_8] : memref<2x256xf32, #tpu.memory_space<vmem>>, vector<2x256xf32>
    %cst_9 = arith.constant dense<0.000000e+00> : vector<2x256xf32>
    %11 = tpu.matmul %9, %10, %cst_9 {dimension_numbers = #tpu.dot_dimension_numbers<[1], [0], [0], [1], [0, 0, 1, 1], [], []>} : vector<2x2xf32>, vector<2x256xf32>, vector<2x256xf32> -> vector<2x256xf32>
    %c0_10 = arith.constant 0 : index
    %c0_11 = arith.constant 0 : index
    %12 = vector.load %arg5[%c0_10, %c0_11] : memref<2x256xf32, #tpu.memory_space<vmem>>, vector<2x256xf32>
    tpu.vector_store %arg5[%c0_10, %c0_11], %11 {strides = array<i32>} : memref<2x256xf32, #tpu.memory_space<vmem>>, vector<2x256xf32>,
    return
  }
  func.func @transform_0(%arg0: i32) -> (i32, i32) {
    %c0_i32 = arith.constant 0 : i32
    %c0_i32_0 = arith.constant 0 : i32
    return %arg0, %c0_i32 : i32, i32
  }
  func.func @transform_1(%arg0: i32) -> (i32, i32) {
    %c0_i32 = arith.constant 0 : i32
    %c0_i32_0 = arith.constant 0 : i32
    %c0_i32_1 = arith.constant 0 : i32
    return %c0_i32, %c0_i32_0 : i32, i32
  }
  func.func @transform_2(%arg0: i32) -> (i32, i32) {
    %c0_i32 = arith.constant 0 : i32
    %c0_i32_0 = arith.constant 0 : i32
    %c0_i32_1 = arith.constant 0 : i32
    return %c0_i32, %c0_i32_0 : i32, i32
  }
  func.func @transform_3(%arg0: i32) -> (i32, i32) {
    %c0_i32 = arith.constant 0 : i32
    %c0_i32_0 = arith.constant 0 : i32
    %c0_i32_1 = arith.constant 0 : i32
    return %c0_i32, %c0_i32_0 : i32, i32
  }
  func.func @transform_4(%arg0: i32) -> (i32, i32) {
    %c0_i32 = arith.constant 0 : i32
    %c0_i32_0 = arith.constant 0 : i32
    return %arg0, %c0_i32 : i32, i32
  }
}

</mosaic_0001>

<bundles_post_ra>
// kernel: tpu_custom_call.1
= control target key start
LH: loop header
LB: loop body
LE: loop exit
PB: predicated region body
PF: predicated region fallthrough
CT: control target
= control target key end

     0   :  { %9 = vsyncpa [#allocation3], 0  ;;  %s412_s0 = inlined_call_operand.hbm [shape: f32[2,32], index: 0, kind: input, shape index: {}]   ;;  %s413_s1 = inlined_call_operand.hbm [shape: f32[2,32], index: 1, kind: input, shape index: {}]   ;;  %s414_s2 = inlined_call_operand.hbm [shape: f32[2,32], index: 2, kind: input, shape index: {}]   ;;  %s415_s3 = inlined_call_operand.hbm [shape: f32[2,256], index: 3, kind: input, shape index: {}]   ;;  %s416_s4 = inlined_call_operand.hbm [shape: f32[2,256], index: 4, kind: output, shape index: {}]  }
   0x1   :  { %10 = vsyncpa [#allocation6], 0 }
   0x2   :  { %11 = vsyncpa [#allocation9], 0  ;;  %s29_s17 = sshll.u32 %s413_s1, 4  ;;  %s30_s17 = int_to_ptr.hbm [resolvable:$true] %s29_s17 }
   0x3   :  { %12 = vsyncpa [#allocation4], 0  ;;  %s364_s18 = smov [#allocation5]   ;;  %s18_s22 = sshll.u32 %s412_s0, 4  ;;  %s19_s22 = int_to_ptr.hbm [resolvable:$true] %s18_s22 }
   0x4   :  { %s31_s19 = sshll.u32 %s364_s18, 4  ;;  %s365_s23 = smov [#allocation2]   ;;  %s32_s19 = int_to_ptr.vmem [resolvable:$true] %s31_s19 }
   0x5   :  { %34 = dma.hbm_to_vmem [thread:$0]  %s30_s17, 32, %s32_s19, [#allocation6]  }
   0x6   :  { %s20_s24 = sshll.u32 %s365_s23, 4  ;;  %s40_s27 = sshll.u32 %s414_s2, 4  ;;  %s21_s24 = int_to_ptr.vmem [resolvable:$true] %s20_s24  ;;  %s41_s27 = int_to_ptr.hbm [resolvable:$true] %s40_s27 }
   0x7   :  { %23 = dma.hbm_to_vmem [thread:$0]  %s19_s22, 32, %s21_s24, [#allocation3]  }
   0x8   :  { %s51_s29 = sshll.u32 %s415_s3, 4  ;;  %s366_s30 = smov [#allocation7]   ;;  %s52_s29 = int_to_ptr.hbm [resolvable:$true] %s51_s29 }
   0x9   :  { %s42_s5 = sshll.u32 %s366_s30, 4  ;;  %s367_s0 = smov [#allocation8]   ;;  %s43_s5 = int_to_ptr.vmem [resolvable:$true] %s42_s5 }
   0xa   :  { %45 = dma.hbm_to_vmem [thread:$0]  %s41_s27, 32, %s43_s5, [#allocation6]  }
   0xb   :  { %s53_s6 = sshll.u32 %s367_s0, 4  ;;  %s54_s6 = int_to_ptr.vmem [resolvable:$true] %s53_s6 }
   0xc   :  { %56 = dma.hbm_to_vmem [thread:$0]  %s52_s29, 64, %s54_s6, [#allocation9]  }
   0xd   :  { %356 = dma.done.wait [#allocation3], 32  }
   0xe   :  { %357 = vsyncadd [#allocation3], 4294967264 }
   0xf   :  { %358 = dma.done.wait [#allocation6], 64  }
  0x10   :  { %359 = vsyncadd [#allocation6], 4294967232 }
  0x11   :  { %360 = dma.done.wait [#allocation9], 64  }
  0x12   :  { %361 = vsyncadd [#allocation9], 4294967232  ;;  %vm76_vm0 = vcmask 261120   ;;  %v142_v0 = vld [vmem:[#allocation8] sm:$0xf]  ;;  %vm151_vm1 = vcmask 1041408  }
  0x13   :  { %v75_v1 = vld [vmem:[#allocation7] sm:$0x3]  ;;  %v73_v2 = vld [vmem:[#allocation2] sm:$0x3]  ;;  %144 = vst [vmem:[#allocation1] ss:$4 sm:$0xff] %v142_v0 }
  0x14   :  { %223 = vmatpush.xpose.msk.msra.mxu1 %vm76_vm0, %v75_v1  ;;  %v103_v3 = vmul.f32 %v73_v2, %v73_v2  ;;  %v74_v4 = vld [vmem:[#allocation5] sm:$0x3]  ;;  %vm147_vm5 = vcmask 15360   ;;  %s368_s2 = smov [#allocation10]   ;;  %s209_s9 = sshll.u32 %s416_s4, 4  ;;  %s210_s9 = int_to_ptr.hbm [resolvable:$true] %s209_s9 }
  0x15   :  { %221 = vmatpush.xpose.msk.msra.mxu0 %vm76_vm0, %v74_v4  ;;  %s207_s3 = sshll.u32 %s368_s2, 4  ;;  %s208_s3 = int_to_ptr.vmem [resolvable:$true] %s207_s3 }
  0x17   :  { %224 = vmatmul.msk.f32.vlgmr.msra.gmra.mxu1 %vm76_vm0, %v103_v3 }
  0x18   :  { %222 = vmatmul.msk.f32.vlgmr.msra.gmra.mxu0 %vm76_vm0, %v73_v2 }
  0x1a   :  { %v145_v5 = vld.sshfl [vmem:[#allocation1] sm:$0xff pattern:$0x73625140]  ;;  %v146_v6 = vld.sshfl [vmem:[#allocation1 + $0x8] sm:$0xff pattern:$0x73625140] }
  0x1b   :  { %225 = vmatpush.msk.msra.mxu2 %vm151_vm1, %v145_v5  ;;  %227 = vmatpush.msk.msra.mxu3 %vm151_vm1, %v146_v6 }
  0x94   :  { %v127_v7 = vpop.f32.mrf.mxu1 }
  0x95   :  { %v130_v8 = vmax.f32 %v127_v7, 1e-24  ;;  %v100_v14 = vpop.f32.mrf.mxu0 }
  0x97   :  { %234 = vrsqrt.f32 %v130_v8  ;;  %vm137_vm3 = vweird.f32 %v130_v8 }
  0x9d   :  { %v235_v9 = vpop.eup %234 }
  0x9e   :  { %v132_v10 = vmul.f32 %v235_v9, %v130_v8  ;;  %vm138_vm2 = vweird.f32 %v235_v9 }
  0x9f   :  { %vm139_vm4 = vmor %vm137_vm3, %vm138_vm2 }
  0xa0   :  { %v133_v11 = vmul.f32 %v235_v9, %v132_v10 }
  0xa2   :  { %v134_v12 = vmul.f32 0.5, %v133_v11 }
  0xa4   :  { %v135_v13 = vsub.f32 1.5, %v134_v12 }
  0xa6   :  { %v136_v15 = vmul.f32 %v235_v9, %v135_v13 }
  0xa8   :  { %v140_v16 = vsel %vm139_vm4, %v235_v9, %v136_v15 }
  0xa9   :  { %v141_v17 = vmul.f32 %v140_v16, %v100_v14 }
  0xab   :  { %226 = vmatmul.msk.f32.vlgmr.msra.gmra.mxu2 %vm147_vm5, %v141_v17  ;;  %228 = vmatmul.msk.f32.vlgmr.msra.gmra.mxu3 %vm147_vm5, %v141_v17 }
 0x12e   :  { %v193_v18 = vpop.f32.mrf.mxu3  ;;  %v173_v20 = vpop.f32.mrf.mxu2 }
 0x12f   :  { %v198_v19 = vrot.slane %v193_v18, 6 }
 0x131   :  { %v199_v21 = vsel %vm151_vm1, %v173_v20, %v198_v19 }
 0x132   :  { %201 = vst [vmem:[#allocation10] sm:$0xf] %v199_v21 }
 0x133   :  { %212 = dma.vmem_to_hbm [thread:$0]  %s208_s3, 64, %s210_s9, [#allocation4]  }
 0x134   :  { %362 = dma.done.wait [#allocation4], 64  }
 0x135   :  { %363 = vsyncadd [#allocation4], 4294967232 }
 0x136   :  { %217 = vsyncpa [#allocation3], 1 }
 0x137   :  { %218 = vsyncpa [#allocation6], 1 }
 0x138   :  { %219 = vsyncpa [#allocation9], 1 }
 0x139   :  { %220 = vsyncpa [#allocation4], 1 }

</bundles_post_ra>
